<compile_context>
chip_gen: v6e
topology: v6e:2x2x1
jax: 0.10.0
libtpu: 0.0.40
codegen_flags: <defaults>
</compile_context>

<pallas_src>
import functools
import math

import jax
import jax.numpy as jnp
from jax import lax
from jax.experimental import pallas as pl
from jax.experimental.pallas import tpu as pltpu


# ----------------------------- in-kernel helpers -----------------------------

def _layernorm(x, gamma, beta, eps):
    # x: [S, D] float32; gamma/beta: [1, D]
    mu = jnp.mean(x, axis=-1, keepdims=True)
    var = jnp.mean((x - mu) ** 2, axis=-1, keepdims=True)
    return (x - mu) * lax.rsqrt(var + eps) * gamma + beta


def _gelu_tanh(x):
    c = math.sqrt(2.0 / math.pi)
    return 0.5 * x * (1.0 + jnp.tanh(c * (x + 0.044715 * x * x * x)))


# --------------------------------- kernels -----------------------------------

def embed_kernel(patch_ref, w_ref, b_ref, pos_ref, out_ref):
    # patch_ref: [1, N, CPP] f32; w_ref: [CPP, D] bf16; b_ref: [1, D]; pos_ref: [N, D]
    x = patch_ref[0].astype(jnp.bfloat16)
    y = jnp.dot(x, w_ref[...], preferred_element_type=jnp.float32)
    out_ref[0] = y + b_ref[...] + pos_ref[...]


def encoder_kernel(x_ref,
                   ln1g_ref, ln1b_ref,
                   wq_ref, bq_ref, wk_ref, bk_ref, wv_ref, bv_ref,
                   wo_ref, bo_ref,
                   ln2g_ref, ln2b_ref,
                   w1_ref, b1_ref, w2_ref, b2_ref,
                   out_ref,
                   act_ref,
                   *, num_heads, head_dim, scale, eps):
    # grid = (B, L): batch parallel, layers sequential ("arbitrary").
    layer = pl.program_id(1)

    # Load the embedding into the carried VMEM activation on the first layer.
    @pl.when(layer == 0)
    def _():
        act_ref[...] = x_ref[0]

    x = act_ref[...]                                        # [S, D] f32 (residual path)

    # ------------------------- self-attention block -------------------------
    h = _layernorm(x, ln1g_ref[0], ln1b_ref[0], eps).astype(jnp.bfloat16)
    q = jnp.dot(h, wq_ref[0], preferred_element_type=jnp.float32) + bq_ref[0]
    k = jnp.dot(h, wk_ref[0], preferred_element_type=jnp.float32) + bk_ref[0]
    v = jnp.dot(h, wv_ref[0], preferred_element_type=jnp.float32) + bv_ref[0]

    # Head split: [S, D] -> [H, S, hd] (bf16 MXU operands), then batched dots.
    def split_heads(t):
        parts = [t[:, hh * head_dim:(hh + 1) * head_dim] for hh in range(num_heads)]
        return jnp.stack(parts, axis=0).astype(jnp.bfloat16)

    q3 = split_heads(q)
    k3 = split_heads(k)
    v3 = split_heads(v)

    s = jnp.einsum('hqd,hkd->hqk', q3, k3,
                   preferred_element_type=jnp.float32) * scale      # [H, S, S] f32
    s_max = jnp.max(s, axis=-1, keepdims=True)
    p = jnp.exp(s - s_max)
    denom = jnp.sum(p, axis=-1, keepdims=True)
    p = p * pl.reciprocal(denom, approx=True)                       # softmax (f32)

    ctx3 = jnp.einsum('hqk,hkd->hqd', p.astype(jnp.bfloat16), v3,
                      preferred_element_type=jnp.float32)           # [H, S, hd] f32
    ctx = jnp.concatenate([ctx3[hh] for hh in range(num_heads)], axis=-1)  # [S, D]

    attn_out = jnp.dot(ctx.astype(jnp.bfloat16), wo_ref[0],
                       preferred_element_type=jnp.float32) + bo_ref[0]
    x = x + attn_out

    # ------------------------------ MLP block --------------------------------
    h = _layernorm(x, ln2g_ref[0], ln2b_ref[0], eps).astype(jnp.bfloat16)
    h1 = jnp.dot(h, w1_ref[0], preferred_element_type=jnp.float32) + b1_ref[0]
    h1 = _gelu_tanh(h1).astype(jnp.bfloat16)
    h2 = jnp.dot(h1, w2_ref[0], preferred_element_type=jnp.float32) + b2_ref[0]
    x = x + h2

    act_ref[...] = x

    # Write the HBM output only after the last layer for this batch element.
    @pl.when(layer == pl.num_programs(1) - 1)
    def _():
        out_ref[0] = x


def post_layernorm_kernel(x_ref, g_ref, b_ref, out_ref, *, eps):
    out_ref[0] = _layernorm(x_ref[0], g_ref[...], b_ref[...], eps)


# ------------------------------- model wrapper --------------------------------

def init_params(key, cfg):
    D = cfg["hidden_size"]
    I = cfg["intermediate_size"]
    C = cfg["num_channels"]
    P = cfg["patch_size"]
    L = cfg["num_hidden_layers"]
    N = (cfg["image_size"] // P) ** 2
    CPP = C * P * P

    def nrm(k, shape, scale=0.02, dtype=jnp.float32):
        return (scale * jax.random.normal(k, shape)).astype(dtype)

    keys = jax.random.split(key, 8)
    # Weights stored in bf16 (halves HBM->VMEM DMA; f32 accumulation in-kernel).
    params = {
        "patch_w": nrm(keys[0], (CPP, D), dtype=jnp.bfloat16),   # (c,kh,kw) x D
        "patch_b": jnp.zeros((1, D), jnp.float32),
        "pos_emb": nrm(keys[1], (N, D)),
        "post_ln_g": jnp.ones((1, D), jnp.float32),
        "post_ln_b": jnp.zeros((1, D), jnp.float32),
        # layer-stacked parameters (leading axis = layer index)
        "ln1_g": jnp.ones((L, 1, D), jnp.float32),
        "ln1_b": jnp.zeros((L, 1, D), jnp.float32),
        "wq": nrm(keys[2], (L, D, D), dtype=jnp.bfloat16),
        "bq": jnp.zeros((L, 1, D), jnp.float32),
        "wk": nrm(keys[3], (L, D, D), dtype=jnp.bfloat16),
        "bk": jnp.zeros((L, 1, D), jnp.float32),
        "wv": nrm(keys[4], (L, D, D), dtype=jnp.bfloat16),
        "bv": jnp.zeros((L, 1, D), jnp.float32),
        "wo": nrm(keys[5], (L, D, D), dtype=jnp.bfloat16),
        "bo": jnp.zeros((L, 1, D), jnp.float32),
        "ln2_g": jnp.ones((L, 1, D), jnp.float32),
        "ln2_b": jnp.zeros((L, 1, D), jnp.float32),
        "w1": nrm(keys[6], (L, D, I), dtype=jnp.bfloat16),
        "b1": jnp.zeros((L, 1, I), jnp.float32),
        "w2": nrm(keys[7], (L, I, D), dtype=jnp.bfloat16),
        "b2": jnp.zeros((L, 1, D), jnp.float32),
    }
    return params


def siglip_vision_forward(pixel_values, params, cfg):
    B, C, H, W = pixel_values.shape
    P = cfg["patch_size"]
    D = cfg["hidden_size"]
    I = cfg["intermediate_size"]
    L = cfg["num_hidden_layers"]
    nh, nw = H // P, W // P
    N = nh * nw
    CPP = C * P * P
    eps = cfg["layer_norm_eps"]
    num_heads = cfg["num_attention_heads"]
    head_dim = D // num_heads
    scale = float(head_dim) ** -0.5

    # --- patch extraction (glue): NCHW -> [B, N, C*P*P], (c,kh,kw) order ---
    x = pixel_values.reshape(B, C, nh, P, nw, P)
    patches = x.transpose(0, 2, 4, 1, 3, 5).reshape(B, N, CPP)

    batch_cparams = pltpu.CompilerParams(dimension_semantics=("parallel",))

    # --- patch embedding + position embedding (Pallas) ---
    emb = pl.pallas_call(
        embed_kernel,
        out_shape=jax.ShapeDtypeStruct((B, N, D), jnp.float32),
        grid=(B,),
        in_specs=[
            pl.BlockSpec((1, N, CPP), lambda b: (b, 0, 0)),
            pl.BlockSpec((CPP, D), lambda b: (0, 0)),
            pl.BlockSpec((1, D), lambda b: (0, 0)),
            pl.BlockSpec((N, D), lambda b: (0, 0)),
        ],
        out_specs=pl.BlockSpec((1, N, D), lambda b: (b, 0, 0)),
        compiler_params=batch_cparams,
    )(patches, params["patch_w"], params["patch_b"], params["pos_emb"])

    # --- fused encoder: one pallas_call, grid = (batch, layers) ---
    layer_kern = functools.partial(encoder_kernel,
                                   num_heads=num_heads, head_dim=head_dim,
                                   scale=scale, eps=eps)

    def wspec(r, c):          # per-layer weight tile, streamed along layer axis
        return pl.BlockSpec((1, r, c), lambda b, l: (l, 0, 0))

    def vspec(d):             # per-layer bias / LN vector
        return pl.BlockSpec((1, 1, d), lambda b, l: (l, 0, 0))

    act_spec = pl.BlockSpec((1, N, D), lambda b, l: (b, 0, 0))

    # Advisory cost hint for the XLA scheduler around the custom call.
    flops = 2 * B * L * (4 * N * D * D + 2 * N * N * D + 2 * N * D * I)
    transcendentals = B * L * (num_heads * N * N + N * I)
    weight_bytes = L * (4 * D * D + 2 * D * I) * 2 + L * (6 * D + I) * 4
    bytes_accessed = weight_bytes + 2 * B * N * D * 4
    cost = pl.CostEstimate(flops=flops, transcendentals=transcendentals,
                           bytes_accessed=bytes_accessed)

    hidden = pl.pallas_call(
        layer_kern,
        out_shape=jax.ShapeDtypeStruct((B, N, D), jnp.float32),
        grid=(B, L),
        in_specs=[
            act_spec,                       # embeddings (read once per batch)
            vspec(D), vspec(D),             # ln1 g/b
            wspec(D, D), vspec(D),          # q
            wspec(D, D), vspec(D),          # k
            wspec(D, D), vspec(D),          # v
            wspec(D, D), vspec(D),          # out_proj
            vspec(D), vspec(D),             # ln2 g/b
            wspec(D, I), vspec(I),          # fc1
            wspec(I, D), vspec(D),          # fc2
        ],
        out_specs=act_spec,
        scratch_shapes=[pltpu.VMEM((N, D), jnp.float32)],   # carried activations
        compiler_params=pltpu.CompilerParams(
            dimension_semantics=("parallel", "arbitrary"),
            vmem_limit_bytes=64 * 1024 * 1024),
        cost_estimate=cost,
    )(emb,
      params["ln1_g"], params["ln1_b"],
      params["wq"], params["bq"], params["wk"], params["bk"],
      params["wv"], params["bv"], params["wo"], params["bo"],
      params["ln2_g"], params["ln2_b"],
      params["w1"], params["b1"], params["w2"], params["b2"])

    # --- post layernorm (Pallas) ---
    out = pl.pallas_call(
        functools.partial(post_layernorm_kernel, eps=eps),
        out_shape=jax.ShapeDtypeStruct((B, N, D), jnp.float32),
        grid=(B,),
        in_specs=[
            pl.BlockSpec((1, N, D), lambda b: (b, 0, 0)),
            pl.BlockSpec((1, D), lambda b: (0, 0)),
            pl.BlockSpec((1, D), lambda b: (0, 0)),
        ],
        out_specs=pl.BlockSpec((1, N, D), lambda b: (b, 0, 0)),
        compiler_params=batch_cparams,
    )(hidden, params["post_ln_g"], params["post_ln_b"])
    return out


# ------------------------------------ main ------------------------------------

if __name__ == "__main__":
    cfg = dict(
        hidden_size=32,
        intermediate_size=64,
        num_hidden_layers=2,
        num_attention_heads=4,
        num_channels=3,
        image_size=16,
        patch_size=4,
        layer_norm_eps=1e-6,
        attention_dropout=0.0,   # eval mode: dropout is identity
    )
    B = 2

    key = jax.random.PRNGKey(0)
    k_param, k_input = jax.random.split(key)
    params = init_params(k_param, cfg)

    pixel_values = jax.random.normal(
        k_input, (B, cfg["num_channels"], cfg["image_size"], cfg["image_size"]),
        dtype=jnp.float32)

    out = siglip_vision_forward(pixel_values, params, cfg)
    out = jax.block_until_ready(out)

    N = (cfg["image_size"] // cfg["patch_size"]) ** 2
    assert out.shape == (B, N, cfg["hidden_size"]), out.shape
    assert bool(jnp.all(jnp.isfinite(out)))
    print("KERNEL_OK")
</pallas_src>

<mosaic_0001>
module attributes {stable_mosaic.version = 11 : i64} {
  func.func @embed_kernel(%arg0: i32, %arg1: memref<1x16x48xf32, #tpu.memory_space<vmem>>, %arg2: memref<48x32xbf16, #tpu.memory_space<vmem>>, %arg3: memref<1x32xf32, #tpu.memory_space<vmem>>, %arg4: memref<16x32xf32, #tpu.memory_space<vmem>>, %arg5: memref<1x16x32xf32, #tpu.memory_space<vmem>>) attributes {dimension_semantics = [#tpu.dimension_semantics<parallel>], iteration_bounds = array<i64: 2>, scalar_prefetch = 0 : i64, scratch_operands = 0 : i64, tpu.core_type = #tpu.core_type<tc>, window_params = [{transform_indices = @transform_0, window_bounds = array<i64: 1, 16, 48>}, {pipeline_mode = #tpu.pipeline_mode<synchronous>, transform_indices = @transform_1, window_bounds = array<i64: 48, 32>}, {pipeline_mode = #tpu.pipeline_mode<synchronous>, transform_indices = @transform_2, window_bounds = array<i64: 1, 32>}, {pipeline_mode = #tpu.pipeline_mode<synchronous>, transform_indices = @transform_3, window_bounds = array<i64: 16, 32>}, {transform_indices = @transform_4, window_bounds = array<i64: 1, 16, 32>}]} {
    %c0 = arith.constant 0 : index
    %c0_0 = arith.constant 0 : index
    %c0_1 = arith.constant 0 : index
    %0 = vector.load %arg1[%c0, %c0_0, %c0_1] : memref<1x16x48xf32, #tpu.memory_space<vmem>>, vector<1x16x48xf32>
    %1 = vector.shape_cast %0 : vector<1x16x48xf32> to vector<16x48xf32>
    %2 = arith.truncf %1 : vector<16x48xf32> to vector<16x48xbf16>
    %c0_2 = arith.constant 0 : index
    %c0_3 = arith.constant 0 : index
    %3 = vector.load %arg2[%c0_2, %c0_3] : memref<48x32xbf16, #tpu.memory_space<vmem>>, vector<48x32xbf16>
    %cst = arith.constant dense<0.000000e+00> : vector<16x32xf32>
    %4 = tpu.matmul %2, %3, %cst {dimension_numbers = #tpu.dot_dimension_numbers<[1], [0], [0], [1], [0, 0, 1, 1], [], []>} : vector<16x48xbf16>, vector<48x32xbf16>, vector<16x32xf32> -> vector<16x32xf32>
    %c0_4 = arith.constant 0 : index
    %c0_5 = arith.constant 0 : index
    %5 = vector.load %arg3[%c0_4, %c0_5] : memref<1x32xf32, #tpu.memory_space<vmem>>, vector<1x32xf32>
    %6 = vector.broadcast %5 : vector<1x32xf32> to vector<16x32xf32>
    %7 = arith.addf %4, %6 : vector<16x32xf32>
    %c0_6 = arith.constant 0 : index
    %c0_7 = arith.constant 0 : index
    %8 = vector.load %arg4[%c0_6, %c0_7] : memref<16x32xf32, #tpu.memory_space<vmem>>, vector<16x32xf32>
    %9 = arith.addf %7, %8 : vector<16x32xf32>
    %c0_8 = arith.constant 0 : index
    %c0_9 = arith.constant 0 : index
    %c0_10 = arith.constant 0 : index
    %10 = vector.load %arg5[%c0_8, %c0_9, %c0_10] : memref<1x16x32xf32, #tpu.memory_space<vmem>>, vector<1x16x32xf32>
    %11 = vector.shape_cast %10 : vector<1x16x32xf32> to vector<16x32xf32>
    %12 = vector.shape_cast %9 : vector<16x32xf32> to vector<1x16x32xf32>
    tpu.vector_store %arg5[%c0_8, %c0_9, %c0_10], %12 {strides = array<i32>} : memref<1x16x32xf32, #tpu.memory_space<vmem>>, vector<1x16x32xf32>,
    return
  }
  func.func @transform_0(%arg0: i32) -> (i32, i32, i32) {
    %c0_i32 = arith.constant 0 : i32
    %c0_i32_0 = arith.constant 0 : i32
    %c0_i32_1 = arith.constant 0 : i32
    return %arg0, %c0_i32, %c0_i32_0 : i32, i32, i32
  }
  func.func @transform_1(%arg0: i32) -> (i32, i32) {
    %c0_i32 = arith.constant 0 : i32
    %c0_i32_0 = arith.constant 0 : i32
    %c0_i32_1 = arith.constant 0 : i32
    return %c0_i32, %c0_i32_0 : i32, i32
  }
  func.func @transform_2(%arg0: i32) -> (i32, i32) {
    %c0_i32 = arith.constant 0 : i32
    %c0_i32_0 = arith.constant 0 : i32
    %c0_i32_1 = arith.constant 0 : i32
    return %c0_i32, %c0_i32_0 : i32, i32
  }
  func.func @transform_3(%arg0: i32) -> (i32, i32) {
    %c0_i32 = arith.constant 0 : i32
    %c0_i32_0 = arith.constant 0 : i32
    %c0_i32_1 = arith.constant 0 : i32
    return %c0_i32, %c0_i32_0 : i32, i32
  }
  func.func @transform_4(%arg0: i32) -> (i32, i32, i32) {
    %c0_i32 = arith.constant 0 : i32
    %c0_i32_0 = arith.constant 0 : i32
    %c0_i32_1 = arith.constant 0 : i32
    return %arg0, %c0_i32, %c0_i32_0 : i32, i32, i32
  }
}

</mosaic_0001>

<bundles_post_ra>
// kernel: tpu_custom_call.1
= control target key start
LH: loop header
LB: loop body
LE: loop exit
PB: predicated region body
PF: predicated region fallthrough
CT: control target
= control target key end

     0   :  { %9 = vsyncpa [#allocation3], 0  ;;  %s737_s0 = inlined_call_operand.vmem [shape: f32[2,16,48], index: 0, kind: input, shape index: {}]   ;;  %s738_s1 = inlined_call_operand.vmem [shape: bf16[48,32], index: 1, kind: input, shape index: {}]   ;;  %s739_s2 = inlined_call_operand.vmem [shape: f32[1,32], index: 2, kind: input, shape index: {}]   ;;  %s740_s3 = inlined_call_operand.hbm [shape: f32[16,32], index: 3, kind: input, shape index: {}]   ;;  %s741_s4 = inlined_call_operand.hbm [shape: f32[2,16,32], index: 4, kind: output, shape index: {}]  }
   0x1   :  { %10 = vsyncpa [#allocation4], 0 }
   0x2   :  { %12 = vsyncpa [#allocation4 + $0x1], 0  ;;  %s605_s15 = smov 0   ;;  %s607_s16 = smov 0  }
   0x3   :  { %s609_s17 = smov 0   ;;  %s611_s18 = smov 0  }
   0x4 LB: > { %s626_s19 = sadd.s32 4294967295, %s570_s18   ;;  %s386_s20 = sadd.s32 4294967294, %s570_s18   ;;  %s570_s18 = sphi %s611_s18, %s749_s18   ;;  %s566_s17 = sphi %s609_s17, %s748_s17   ;;  %s562_s16 = sphi %s607_s16, %s747_s16   ;;  %s558_s15 = sphi %s605_s15, %s746_s15  }
   0x5   : > { %s630_s21 = sadd.s32 1, %s570_s18   ;;  %s114_s22 = sadd.s32 1, %s566_s17 }
   0x6   : > { %s111_s23 = ssub.s32 %s570_s18, %s630_s21  ;;  %p124_p0 = scmp.ne.s32.totalorder %s566_s17, %s562_s16 }
   0x7   : > { %p112_p1 = scmp.eq.s32.totalorder %s111_s23, 0  ;;  %p125_p2 = scmp.eq.s32.totalorder %s626_s19, 1 }
   0x8   : > { %p130_p3 = scmp.ne.s32.totalorder %s562_s16, %s558_s15  ;;  %p131_p4 = scmp.eq.s32.totalorder %s386_s20, 1 }
   0x9   : > { %s641_s24 = scalar_select %p112_p1, %s566_s17, %s114_s22  }
   0xa   : > { %p643_p5 = por %p125_p2, %p124_p0  ;;  %p647_p6 = por %p131_p4, %p130_p3 }
   0xb   : > { %p387_p7 = scmp.ge.s32.totalorder %s570_s18, 1  ;;  %p138_p8 = scmp.lt.s32.totalorder %s570_s18, 3 }
   0xc   : > { %s743_s26 = scalar_select %p647_p6, 1, 0 }
   0xd   : > { %p435_p9 = scmp.eq.s32.totalorder %s626_s19, 0  ;;  %p654_p10 = pnand %p387_p7, %p138_p8 }
   0xe   : > { %s572_s28 = smov [#allocation2]  }
   0xf   : > { %s156_s29 = sshll.u32 %s572_s28, 4  ;;  %p427_p11 = pneg %p654_p10  ;;  %s157_s29 = int_to_ptr.vmem [resolvable:$true] %s156_s29 }
  0x10   : > { %s491_s30 = scalar_lea.vmem %s157_s29, 256  ;;  %p499_p3 = scmp.lt.s32.totalorder %s157_s29, %s157_s29 }
  0x11   : > { %p428_p12 = pnand %p435_p9, %p427_p11  ;;  %p492_p0 = scmp.ne.s32.totalorder %s157_s29, %s491_s30 }
  0x12   : > { %p500_p4 = scmp.lt.s32.totalorder %s491_s30, %s491_s30 }
  0x13   : > { %p482_p13 = pneg %p428_p12 }
  0x14   : > { %p501_p6 = por %p500_p4, %p499_p3 }
  0x15   : > { %p494_p1 = pnand %p492_p0, %p482_p13 }
  0x17   : > { %p495_p2 = pneg %p494_p1 }
  0x19   : > { %p502_p7 = pnand %p501_p6, %p495_p2 }
  0x1b   : > { %505 = shalt.err (!%p502_p7)
}
  0x1c   : > { %s573_s5 = smov 128   ;;  %s574_s6 = smov 8  }
  0x1d   : > { %430 = dma.hbm_to_vmem [thread:$0]  (!%p428_p12), %s740_s3, 256, %s157_s29, [#allocation3], %s573_s5, %s573_s5, %s574_s6  }
  0x1e   : > { %180 = sbr.rel (%p654_p10) target bundleno = 264 (0x108), region = 36 }
  0x23   : > { %549 = dma.done.wait (%p435_p9), [#allocation3], 256  }
  0x24   : > { %551 = vsyncadd (%p435_p9), [#allocation3], 4294967040  ;;  %p206_p8 = scmp.lt.s32.totalorder %s626_s19, 1  ;;  %v575_v0 = vmov 0.0   ;;  %vm576_vm0 = vmmov 0   ;;  %v477_v1 = vld [vmem:[%s738_s1 + $0x10] sm:$0xff]  }
  0x25   : > { %411 = vmatprep.subr.bf16.mxu0 %v575_v0  ;;  %417 = vmatprep.mubr.msk.bf16.mxu0 %vm576_vm0, %v575_v0  ;;  %v478_v2 = vld [vmem:[%s738_s1 + $0x8] sm:$0xff]   ;;  %v479_v3 = vld [vmem:[%s738_s1] sm:$0xff]   ;;  %vm246_vm1 = vcmask 392192   ;;  %s203_s29 = sand.u32 1, %s562_s16   ;;  %vm295_vm2 = vcmask 261120   ;;  %s406_s7 = sshll.u32 %s626_s19, 8 }
  0x26   : > { %s207_s9 = scalar_select %p206_p8, %s626_s19, 1  ;;  %412 = vmatpush3.bf16.msra.mxu0 %v477_v1  ;;  %v395_v7 = vld [vmem:[%s739_s2] ss:$0 sm:$0xff]  ;;  %v292_v14 = vld [vmem:[#allocation2 + $0x8] sm:$0xff] }
  0x27   : > { %413 = vmatprep.subr.bf16.mxu0 %v575_v0  ;;  %s392_s6 = sshll.u32 %s203_s29, 4  ;;  %v291_v9 = vld [vmem:[#allocation2] sm:$0xff]  ;;  %s697_s19 = scalar_lea.sflag [#allocation4], %s203_s29 }
  0x28   : > { %s405_s12 = sshll.u32 %s207_s9, 4  ;;  %s205_s8 = scalar_lea.vmem [#allocation5], %s392_s6 }
  0x29   : > { %s210_s23 = scalar_lea.vmem %s737_s0, %s405_s12  ;;  %s312_s9 = sshll.u32 %s205_s8, 4  ;;  %s695_s9 = int_to_ptr.vmem [resolvable:$true] %s312_s9 }
  0x2a   : > { %414 = vmatpush3.bf16.msra.mxu0 %v478_v2  ;;  %v212_v4 = vld [vmem:[%s210_s23] sm:$0xff]  ;;  %v213_v5 = vld [vmem:[%s210_s23 + $0x8] sm:$0xff]  ;;  %s693_s12 = scalar_lea.hbm %s741_s4, %s406_s7  ;;  %s506_s13 = scalar_lea.vmem %s695_s9, 256 }
  0x2b   : > { %415 = vmatprep.subr.bf16.mxu0 %v575_v0  ;;  %v214_v6 = vpack.c.bf16 %v213_v5, %v212_v4  ;;  %p507_p6 = scmp.ne.s32.totalorder %s695_s9, %s506_s13  ;;  %s577_s14 = smov [#allocation5]  }
  0x2c   : > { %s510_s20 = sshll.u32 %s577_s14, 4  ;;  %s511_s20 = int_to_ptr.vmem [resolvable:$false] %s510_s20 }
  0x2d   : > { %p508_p9 = pnand %p507_p6, %p643_p5  ;;  %s512_s22 = scalar_lea.vmem %s511_s20, 512 }
  0x2e   : > { %416 = vmatpush3.bf16.msra.mxu0 %v479_v3  ;;  %p513_p11 = scmp.lt.s32.totalorder %s695_s9, %s511_s20  ;;  %p514_p12 = scmp.lt.s32.totalorder %s512_s22, %s506_s13 }
  0x2f   : > { %p509_p10 = pneg %p508_p9 }
  0x30   : > { %p515_p13 = por %p514_p12, %p513_p11 }
  0x31   : > { %418 = vmatmul.mubr.msk.bf16.vlgmr.msra.gmra.mxu0 %vm246_vm1, %v214_v6 }
  0x32   : > { %p516_p0 = pnand %p515_p13, %p509_p10 }
  0xf1   : > { %v284_v8 = vpop.f32.mrf.mxu0 }
  0xf2   : > { %v285_v10 = vadd.f32 %v395_v7, %v284_v8 }
  0xf3   : > { %v419_v11 = vpop.f32.mrf.mxu0 }
  0xf4   : > { %v293_v12 = vadd.f32 %v291_v9, %v285_v10 }
  0xf5   : > { %v287_v13 = vpop.f32.mrf.mxu0 }
  0xf6   : > { %296 = vst.msk [vmem:[%s205_s8] sm:$0xff] %vm295_vm2, %v293_v12  ;;  %v288_v15 = vadd.f32 %v395_v7, %v287_v13 }
  0xf7   : > { %v420_v16 = vpop.f32.mrf.mxu0 }
  0xf8   : > { %v294_v17 = vadd.f32 %v292_v14, %v288_v15 }
  0xfa   : > { %297 = vst.msk [vmem:[%s205_s8 + $0x8] sm:$0xff] %vm295_vm2, %v294_v17 }
  0xfb   : > { %519 = shalt.err (!%p516_p0)
}
  0xfc   : > { %s520_s23 = scalar_lea.hbm %s693_s12, 256  ;;  %s524_s29 = scalar_lea.hbm %s741_s4, 512 }
  0xfd   : > { %p521_p1 = scmp.ne.s32.totalorder %s693_s12, %s520_s23  ;;  %p525_p4 = scmp.lt.s32.totalorder %s693_s12, %s741_s4 }
  0xfe   : > { %p526_p7 = scmp.lt.s32.totalorder %s524_s29, %s520_s23 }
  0xff   : > { %p522_p2 = pnand %p521_p1, %p643_p5 }
 0x100   : > { %p527_p8 = por %p526_p7, %p525_p4 }
 0x101   : > { %p523_p3 = pneg %p522_p2 }
 0x103   : > { %p528_p6 = pnand %p527_p8, %p523_p3 }
 0x105   : > { %531 = shalt.err (!%p528_p6)
}
 0x106   : > { %s578_s6 = smov 128   ;;  %s579_s7 = smov 8  }
 0x107   : > { %425 = dma.vmem_to_hbm [thread:$0]  (%p643_p5), %s695_s9, 256, %s693_s12, %s697_s19, %s578_s6, %s578_s6, %s579_s7  }
 0x108 PF: > { %p437_p9 = scmp.ge.s32.totalorder %s570_s18, 2  ;;  %s327_s8 = sand.u32 1, %s558_s15  }
 0x109   : > { %p745_p10 = scmp.ne.s32.totalorder %s743_s26, 0  ;;  %s328_s10 = scalar_lea.sflag [#allocation4], %s327_s8 }
 0x10b   : > { %p432_p11 = pnand %p437_p9, %p745_p10 }
 0x10d   : > { %p433_p12 = pneg %p432_p11 }
 0x10f   : > { %553 = dma.done.wait (%p433_p12), %s328_s10, 256  }
 0x110   : > { %555 = vsyncadd (%p433_p12), %s328_s10, 4294967040  ;;  %p15_p13 = scmp.ge.s32.totalorder %s630_s21, 4   ;;  %s746_s15 = smov %s562_s16 }
 0x111   : > { %s747_s16 = smov %s566_s17  ;;  %s748_s17 = smov %s641_s24 }
 0x112   : > { %s749_s18 = smov %s630_s21  ;;  %17 = sbr.rel (!%p15_p13) target bundleno = 4 (0x4), region = 76 }
 0x117   :  { %333 = vsyncpa [#allocation3], 1 }
 0x118   :  { %335 = vsyncpa [#allocation3 + $0x1], 1 }
 0x119   :  { %336 = vsyncpa [#allocation4], 1 }
 0x11a   :  { %338 = vsyncpa [#allocation4 + $0x1], 1 }

</bundles_post_ra>
